<compile_context>
chip_gen: v7x
topology: tpu7x:2x2x1
jax: 0.10.0
libtpu: 0.0.40
codegen_flags: <defaults>
</compile_context>

<pallas_src>
import math

import jax
import jax.numpy as jnp
from jax.experimental import pallas as pl
from jax.experimental.pallas import tpu as pltpu

_SQRT1_2 = 1.0 / math.sqrt(2.0)


# ---------------------------------------------------------------------------
# Kernel: one (TM rows) x (TN out-features) tile of GEGLU
# ---------------------------------------------------------------------------
def geglu_kernel(x_ref, wh_ref, bh_ref, wg_ref, bg_ref, o_ref):
    x = x_ref[...]                                            # (TM, C) bf16
    h = jnp.dot(x, wh_ref[...], preferred_element_type=jnp.float32) + bh_ref[...]
    g = jnp.dot(x, wg_ref[...], preferred_element_type=jnp.float32) + bg_ref[...]
    # exact (erf-based) GELU, matching torch.nn.functional.gelu default
    gelu_g = 0.5 * g * (1.0 + jax.lax.erf(g * _SQRT1_2))
    o_ref[...] = (h * gelu_g).astype(o_ref.dtype)


def _pick_tile(n, candidates):
    for c in candidates:
        if n >= c and n % c == 0:
            return c
    return n


# ---------------------------------------------------------------------------
# Wrapper
# ---------------------------------------------------------------------------
def geglu(x, w, b):
    """x: (..., dim_in); w: (dim_in, 2*dim_out); b: (2*dim_out,) -> (..., dim_out)."""
    orig_dtype = x.dtype
    *lead, dim_in = x.shape
    dim_out = w.shape[1] // 2

    # Split the projection into hidden / gate halves (no 2*dim_out-wide
    # intermediate, no in-kernel lane slice). Weights go to bf16 (halves DMA).
    w_h = w[:, :dim_out].astype(jnp.bfloat16)
    w_g = w[:, dim_out:].astype(jnp.bfloat16)
    b_h = b[:dim_out].reshape(1, dim_out).astype(jnp.float32)
    b_g = b[dim_out:].reshape(1, dim_out).astype(jnp.float32)

    # Fold all leading dims into the matmul M dimension.
    rows = 1
    for d in lead:
        rows *= d
    x2 = x.reshape(rows, dim_in).astype(jnp.bfloat16)

    tm = 256 if rows >= 256 else 128
    rows_p = pl.cdiv(rows, tm) * tm
    if rows_p != rows:
        x2 = jnp.pad(x2, ((0, rows_p - rows), (0, 0)))

    tn = _pick_tile(dim_out, (512, 256, 128))
    grid = (rows_p // tm, dim_out // tn)

    out = pl.pallas_call(
        geglu_kernel,
        out_shape=jax.ShapeDtypeStruct((rows_p, dim_out), orig_dtype),
        grid=grid,
        in_specs=[
            # x tile is constant across the inner (j) axis -> fetched once per row tile
            pl.BlockSpec((tm, dim_in), lambda i, j: (i, 0)),
            pl.BlockSpec((dim_in, tn), lambda i, j: (0, j)),
            pl.BlockSpec((1, tn), lambda i, j: (0, j)),
            pl.BlockSpec((dim_in, tn), lambda i, j: (0, j)),
            pl.BlockSpec((1, tn), lambda i, j: (0, j)),
        ],
        out_specs=pl.BlockSpec((tm, tn), lambda i, j: (i, j)),
        compiler_params=pltpu.CompilerParams(
            dimension_semantics=("parallel", "parallel"),
            vmem_limit_bytes=64 * 1024 * 1024,
        ),
    )(x2, w_h, b_h, w_g, b_g)

    out = out[:rows]
    return out.reshape(*lead, dim_out)


# ---------------------------------------------------------------------------
# Pure-JAX reference (f32) for correctness checking
# ---------------------------------------------------------------------------
def geglu_reference(x, w, b):
    proj = x @ w + b
    dim_out = w.shape[1] // 2
    hidden, gate = proj[..., :dim_out], proj[..., dim_out:]
    return hidden * (0.5 * gate * (1.0 + jax.lax.erf(gate * _SQRT1_2)))


if __name__ == "__main__":
    # Small but tiling-exercising shapes: 2*96 = 192 rows (padded to 256, two
    # TM=128 row tiles), dim_out=384 -> three TN=128 feature tiles.
    B, S, dim_in, dim_out = 2, 96, 128, 384

    key = jax.random.PRNGKey(0)
    kx, kw, kb = jax.random.split(key, 3)

    x = jax.random.normal(kx, (B, S, dim_in), dtype=jnp.float32)
    w = (jax.random.normal(kw, (dim_in, 2 * dim_out), dtype=jnp.float32)
         / math.sqrt(dim_in))
    b = 0.1 * jax.random.normal(kb, (2 * dim_out,), dtype=jnp.float32)

    out = jax.block_until_ready(geglu(x, w, b))
    ref = jax.block_until_ready(geglu_reference(x, w, b))

    assert out.shape == (B, S, dim_out)
    max_err = float(jnp.max(jnp.abs(out - ref)))
    # bf16 matmul operands with f32 accumulation -> loose-ish tolerance
    assert jnp.allclose(out, ref, atol=3e-2, rtol=3e-2), max_err

    print("KERNEL_OK")
</pallas_src>

<mosaic_0001>
module attributes {stable_mosaic.version = 11 : i64} {
  func.func @geglu_kernel(%arg0: i32, %arg1: i32, %arg2: memref<128x128xbf16, #tpu.memory_space<vmem>>, %arg3: memref<128x128xbf16, #tpu.memory_space<vmem>>, %arg4: memref<1x128xf32, #tpu.memory_space<vmem>>, %arg5: memref<128x128xbf16, #tpu.memory_space<vmem>>, %arg6: memref<1x128xf32, #tpu.memory_space<vmem>>, %arg7: memref<128x128xf32, #tpu.memory_space<vmem>>) attributes {dimension_semantics = [#tpu.dimension_semantics<parallel>, #tpu.dimension_semantics<parallel>], iteration_bounds = array<i64: 2, 3>, scalar_prefetch = 0 : i64, scratch_operands = 0 : i64, tpu.core_type = #tpu.core_type<tc>, window_params = [{transform_indices = @transform_0, window_bounds = array<i64: 128, 128>}, {transform_indices = @transform_1, window_bounds = array<i64: 128, 128>}, {transform_indices = @transform_2, window_bounds = array<i64: 1, 128>}, {transform_indices = @transform_3, window_bounds = array<i64: 128, 128>}, {transform_indices = @transform_4, window_bounds = array<i64: 1, 128>}, {transform_indices = @transform_5, window_bounds = array<i64: 128, 128>}]} {
    %c0 = arith.constant 0 : index
    %c0_0 = arith.constant 0 : index
    %0 = vector.load %arg2[%c0, %c0_0] : memref<128x128xbf16, #tpu.memory_space<vmem>>, vector<128x128xbf16>
    %c0_1 = arith.constant 0 : index
    %c0_2 = arith.constant 0 : index
    %1 = vector.load %arg3[%c0_1, %c0_2] : memref<128x128xbf16, #tpu.memory_space<vmem>>, vector<128x128xbf16>
    %cst = arith.constant dense<0.000000e+00> : vector<128x128xf32>
    %2 = tpu.matmul %0, %1, %cst {dimension_numbers = #tpu.dot_dimension_numbers<[1], [0], [0], [1], [0, 0, 1, 1], [], []>} : vector<128x128xbf16>, vector<128x128xbf16>, vector<128x128xf32> -> vector<128x128xf32>
    %c0_3 = arith.constant 0 : index
    %c0_4 = arith.constant 0 : index
    %3 = vector.load %arg4[%c0_3, %c0_4] : memref<1x128xf32, #tpu.memory_space<vmem>>, vector<1x128xf32>
    %4 = vector.broadcast %3 : vector<1x128xf32> to vector<128x128xf32>
    %5 = arith.addf %2, %4 : vector<128x128xf32>
    %c0_5 = arith.constant 0 : index
    %c0_6 = arith.constant 0 : index
    %6 = vector.load %arg5[%c0_5, %c0_6] : memref<128x128xbf16, #tpu.memory_space<vmem>>, vector<128x128xbf16>
    %cst_7 = arith.constant dense<0.000000e+00> : vector<128x128xf32>
    %7 = tpu.matmul %0, %6, %cst_7 {dimension_numbers = #tpu.dot_dimension_numbers<[1], [0], [0], [1], [0, 0, 1, 1], [], []>} : vector<128x128xbf16>, vector<128x128xbf16>, vector<128x128xf32> -> vector<128x128xf32>
    %c0_8 = arith.constant 0 : index
    %c0_9 = arith.constant 0 : index
    %8 = vector.load %arg6[%c0_8, %c0_9] : memref<1x128xf32, #tpu.memory_space<vmem>>, vector<1x128xf32>
    %9 = vector.broadcast %8 : vector<1x128xf32> to vector<128x128xf32>
    %10 = arith.addf %7, %9 : vector<128x128xf32>
    %cst_10 = arith.constant 5.000000e-01 : f32
    %11 = vector.broadcast %cst_10 : f32 to vector<128x128xf32>
    %12 = arith.mulf %11, %10 : vector<128x128xf32>
    %cst_11 = arith.constant 0.707106769 : f32
    %13 = vector.broadcast %cst_11 : f32 to vector<128x128xf32>
    %14 = arith.mulf %10, %13 : vector<128x128xf32>
    %15 = math.erf %14 : vector<128x128xf32>
    %cst_12 = arith.constant 1.000000e+00 : f32
    %16 = vector.broadcast %cst_12 : f32 to vector<128x128xf32>
    %17 = arith.addf %16, %15 : vector<128x128xf32>
    %18 = arith.mulf %12, %17 : vector<128x128xf32>
    %19 = arith.mulf %5, %18 : vector<128x128xf32>
    %c0_13 = arith.constant 0 : index
    %c0_14 = arith.constant 0 : index
    %20 = vector.load %arg7[%c0_13, %c0_14] : memref<128x128xf32, #tpu.memory_space<vmem>>, vector<128x128xf32>
    tpu.vector_store %arg7[%c0_13, %c0_14], %19 {strides = array<i32>} : memref<128x128xf32, #tpu.memory_space<vmem>>, vector<128x128xf32>,
    return
  }
  func.func @transform_0(%arg0: i32, %arg1: i32) -> (i32, i32) {
    %c0_i32 = arith.constant 0 : i32
    %c0_i32_0 = arith.constant 0 : i32
    return %arg0, %c0_i32 : i32, i32
  }
  func.func @transform_1(%arg0: i32, %arg1: i32) -> (i32, i32) {
    %c0_i32 = arith.constant 0 : i32
    %c0_i32_0 = arith.constant 0 : i32
    return %c0_i32, %arg1 : i32, i32
  }
  func.func @transform_2(%arg0: i32, %arg1: i32) -> (i32, i32) {
    %c0_i32 = arith.constant 0 : i32
    %c0_i32_0 = arith.constant 0 : i32
    return %c0_i32, %arg1 : i32, i32
  }
  func.func @transform_3(%arg0: i32, %arg1: i32) -> (i32, i32) {
    %c0_i32 = arith.constant 0 : i32
    %c0_i32_0 = arith.constant 0 : i32
    return %c0_i32, %arg1 : i32, i32
  }
  func.func @transform_4(%arg0: i32, %arg1: i32) -> (i32, i32) {
    %c0_i32 = arith.constant 0 : i32
    %c0_i32_0 = arith.constant 0 : i32
    return %c0_i32, %arg1 : i32, i32
  }
  func.func @transform_5(%arg0: i32, %arg1: i32) -> (i32, i32) {
    %c0_i32 = arith.constant 0 : i32
    return %arg0, %arg1 : i32, i32
  }
}

</mosaic_0001>

<bundles_post_ra>
// kernel: tpu_custom_call.1
= control target key start
LH: loop header
LB: loop body
LE: loop exit
PB: predicated region body
PF: predicated region fallthrough
CT: control target
= control target key end

     0   :  { %s2396_s0 = inlined_call_operand.hbm [shape: bf16[256,128], index: 0, kind: input, shape index: {}]   ;;  %s2397_s1 = inlined_call_operand.hbm [shape: bf16[128,384], index: 1, kind: input, shape index: {}]   ;;  %s2398_s2 = inlined_call_operand.hbm [shape: f32[1,384], index: 2, kind: input, shape index: {}]   ;;  %s2399_s3 = inlined_call_operand.hbm [shape: bf16[128,384], index: 3, kind: input, shape index: {}]   ;;  %s2400_s4 = inlined_call_operand.hbm [shape: f32[1,384], index: 4, kind: input, shape index: {}]   ;;  %s2401_s5 = inlined_call_operand.hbm [shape: f32[256,384], index: 5, kind: output, shape index: {}]  }
   0x1   :  { %2432 = sst [smem:[#allocation31_spill]] %s2396_s0 }
   0x2   :  { %2433 = sst [smem:[#allocation32_spill]] %s2397_s1 }
   0x3   :  { %2434 = sst [smem:[#allocation33_spill]] %s2398_s2 }
   0x4   :  { %2435 = sst [smem:[#allocation34_spill]] %s2399_s3 }
   0x5   :  { %2436 = sst [smem:[#allocation35_spill]] %s2400_s4 }
   0x6   :  { %2437 = sst [smem:[#allocation36_spill]] %s2401_s5 }
   0x7   :  { %10 = vsyncpa [#allocation3], 0 }
   0x8   :  { %12 = vsyncpa [#allocation3 + $0x1], 0 }
   0x9   :  { %13 = vsyncpa [#allocation6], 0 }
   0xa   :  { %15 = vsyncpa [#allocation6 + $0x1], 0 }
   0xb   :  { %16 = vsyncpa [#allocation9], 0 }
   0xc   :  { %18 = vsyncpa [#allocation9 + $0x1], 0 }
   0xd   :  { %19 = vsyncpa [#allocation4], 0 }
   0xe   :  { %21 = vsyncpa [#allocation4 + $0x1], 0  ;;  %s1798_s18 = smov 0   ;;  %s1800_s19 = smov 0  }
   0xf   :  { %s1802_s20 = smov 0   ;;  %s1804_s21 = smov 0  }
  0x10   :  { %s1806_s22 = smov 0   ;;  %s1808_s23 = smov 0  }
  0x11   :  { %s1810_s24 = smov 0   ;;  %s1812_s25 = smov 0  }
  0x12   :  { %s1814_s26 = smov 0   ;;  %s1816_s27 = smov 0  }
  0x13   :  { %s1818_s28 = smov 0   ;;  %s1820_s29 = smov 0  }
  0x14   :  { %s1822_s30 = smov 0   ;;  %s1824_s6 = smov 0  }
  0x15 LB: > { %2438 = sst [smem:[#allocation16_spill]] %s1722_s23  ;;  %p2407_p0 = scmp.eq.s32.totalorder %s1754_s6, 0  ;;  %s1754_s6 = sphi %s1824_s6, %s27_s6   ;;  %s1750_s30 = sphi %s1822_s30, %s2506_s30   ;;  %s1746_s29 = sphi %s1820_s29, %s2513_s29   ;;  %s1742_s28 = sphi %s1818_s28, %s2504_s28   ;;  %s1738_s27 = sphi %s1816_s27, %s2512_s27   ;;  %s1734_s26 = sphi %s1814_s26, %s2503_s26   ;;  %s1730_s25 = sphi %s1812_s25, %s2502_s25   ;;  %s1726_s24 = sphi %s1810_s24, %s2501_s24   ;;  %s1722_s23 = sphi %s1808_s23, %s2500_s23   ;;  %s1718_s22 = sphi %s1806_s22, %s2511_s22   ;;  %s1714_s21 = sphi %s1804_s21, %s2510_s21   ;;  %s1710_s20 = sphi %s1802_s20, %s2509_s20   ;;  %s1706_s19 = sphi %s1800_s19, %s2508_s19   ;;  %s1702_s18 = sphi %s1798_s18, %s2507_s18  }
  0x16   : > { %2439 = sst [smem:[#allocation17_spill]] %s1730_s25  ;;  %p79_p1 = scmp.ne.s32.totalorder %s1722_s23, %s1718_s22 }
  0x17   : > { %2440 = sst [smem:[#allocation18_spill]] %s1734_s26  ;;  %p2405_p4 = scmp.lt.s32.totalorder %s1754_s6, 6 }
  0x18   : > { %2441 = sst [smem:[#allocation19_spill]] %s1738_s27  ;;  %p81_p3 = por %p79_p1, %p2407_p0 }
  0x19   : > { %2442 = sst [smem:[#allocation20_spill]] %s1742_s28  ;;  %s2406_s9 = sand.u32 1, %s1754_s6  }
  0x1a   : > { %2443 = sst [smem:[#allocation21_spill]] %s1750_s30  ;;  %s1880_s10 = sand.u32 1, %s1722_s23  }
  0x1b   : > { %s2402_s11 = sshll.u32 %s1880_s10, 6  ;;  %s2403_s12 = sshll.u32 %s1746_s29, 6 }
  0x1c   : > { %s2444_s1 = sld [smem:[#allocation32_spill]]  ;;  %s240_s16 = scalar_lea.vmem [#allocation5], %s2402_s11 }
  0x1d   : > { %s246_s17 = sshll.u32 %s240_s16, 4  ;;  %p1897_p5 = pnand %p2405_p4, %p81_p3  ;;  %s1893_s17 = int_to_ptr.vmem [resolvable:$true] %s246_s17 }
  0x1e   : > { %s1905_s13 = scalar_lea.sflag [#allocation6], %s2406_s9 }
  0x1f   : > { %s2445_s8 = scalar_select %p1897_p5, 1, 0 }
  0x20   : > { %p1911_p9 = pneg %p1897_p5 }
  0x22   : > { %s1889_s15 = scalar_lea.hbm %s2444_s1, %s2403_s12  ;;  %s1455_s12 = scalar_lea.hbm %s2444_s1, 3072 }
  0x23   : > { %s1450_s14 = scalar_lea.hbm %s1889_s15, 1024  ;;  %p1456_p12 = scmp.lt.u32.totalorder %s1889_s15, %s2444_s1 }
  0x24   : > { %p1451_p8 = scmp.ne.s32.totalorder %s1889_s15, %s1450_s14  ;;  %p1457_p13 = scmp.lt.u32.totalorder %s1455_s12, %s1450_s14 }
  0x25   : > { %p1459_p3 = scmp.lt.u32.totalorder %s1450_s14, %s1889_s15 }
  0x26   : > { %p1453_p10 = pnand %p1911_p9, %p1451_p8  ;;  %p1458_p1 = por %p1457_p13, %p1456_p12 }
  0x28   : > { %p1454_p11 = pneg %p1453_p10  ;;  %p1460_p4 = por %p1459_p3, %p1458_p1 }
  0x2a   : > { %p1461_p2 = pnand %p1460_p4, %p1454_p11 }
  0x2c   : > { %1464 = shalt.err (!%p1461_p2)
}
  0x2d   : > { %s1465_s9 = scalar_lea.vmem %s1893_s17, 1024  ;;  %s1756_s11 = smov [#allocation5]  }
  0x2e   : > { %p1466_p8 = scmp.ne.s32.totalorder %s1893_s17, %s1465_s9  ;;  %s1470_s16 = sshll.u32 %s1756_s11, 4  ;;  %s1471_s16 = int_to_ptr.vmem [resolvable:$false] %s1470_s16 }
  0x2f   : > { %s1472_s5 = scalar_lea.vmem %s1471_s16, 2048  ;;  %p1473_p6 = scmp.lt.s32.totalorder %s1893_s17, %s1471_s16 }
  0x30   : > { %p1468_p10 = pnand %p1466_p8, %p1911_p9  ;;  %p1474_p7 = scmp.lt.s32.totalorder %s1472_s5, %s1465_s9 }
  0x32   : > { %p1469_p0 = pneg %p1468_p10  ;;  %p1475_p12 = por %p1474_p7, %p1473_p6 }
  0x34   : > { %p1476_p13 = pnand %p1475_p12, %p1469_p0 }
  0x36   : > { %1479 = shalt.err (!%p1476_p13)
}
  0x37   : > { %s2410_s27 = smov 192   ;;  %s2411_s12 = smov 64  }
  0x38   : > { %s2413_s14 = smov 4   ;;  %p2447_p0 = scmp.lt.s32.totalorder %s1754_s6, 7 }
  0x39   : > { %1260 = dma.hbm_to_vmem [thread:$0]  (!%p1897_p5), %s1889_s15, 1024, %s1893_s17, %s1905_s13, %s2410_s27, %s2411_s12, %s2413_s14  }
  0x3a   : > { %p2448_p2 = scmp.ge.s32.totalorder %s1754_s6, 1  ;;  %s2451_s11 = sshll.u32 %s1746_s29, 6 }
  0x3b   : > { %s2452_s3 = sld [smem:[#allocation34_spill]]  ;;  %s2453_s28 = sshll.u32 %s1880_s10, 6 }
  0x3c   : > { %p1942_p4 = pnand %p2448_p2, %p2447_p0  ;;  %s277_s4 = scalar_lea.vmem [#allocation8], %s2453_s28 }
  0x3d   : > { %s283_s2 = sshll.u32 %s277_s4, 4  ;;  %s2454_s15 = sand.u32 1, %s1754_s6   ;;  %s1955_s2 = int_to_ptr.vmem [resolvable:$true] %s283_s2 }
  0x3e   : > { %s2449_s9 = scalar_select %p1942_p4, 1, 0 }
  0x3f   : > { %s1959_s17 = scalar_lea.sflag [#allocation9], %s2454_s15 }
  0x40   : > { %2450 = sst [smem:[#allocation22_spill]] %s2449_s9 }
  0x41   : > { %s1951_s1 = scalar_lea.hbm %s2452_s3, %s2451_s11  ;;  %2455 = sst [smem:[#allocation23_spill]] %s1959_s17 }
  0x42   : > { %s1480_s27 = scalar_lea.hbm %s1951_s1, 1024  ;;  %s1485_s5 = scalar_lea.hbm %s2452_s3, 3072 }
  0x43   : > { %p1481_p6 = scmp.ne.s32.totalorder %s1951_s1, %s1480_s27  ;;  %p1486_p1 = scmp.lt.u32.totalorder %s1951_s1, %s2452_s3 }
  0x44   : > { %p1487_p3 = scmp.lt.u32.totalorder %s1485_s5, %s1480_s27  ;;  %p1489_p10 = scmp.lt.u32.totalorder %s1480_s27, %s1951_s1 }
  0x45   : > { %p1483_p7 = pnand %p1481_p6, %p1911_p9 }
  0x46   : > { %p1488_p8 = por %p1487_p3, %p1486_p1 }
  0x47   : > { %p1484_p11 = pneg %p1483_p7 }
  0x48   : > { %p1490_p12 = por %p1489_p10, %p1488_p8 }
  0x4a   : > { %p1491_p13 = pnand %p1490_p12, %p1484_p11 }
  0x4c   : > { %1494 = shalt.err (!%p1491_p13)
}
  0x4d   : > { %s1495_s4 = scalar_lea.vmem %s1955_s2, 1024  ;;  %s1760_s28 = smov [#allocation8]  }
  0x4e   : > { %p1496_p0 = scmp.ne.s32.totalorder %s1955_s2, %s1495_s4  ;;  %s1500_s15 = sshll.u32 %s1760_s28, 4  ;;  %s1501_s15 = int_to_ptr.vmem [resolvable:$false] %s1500_s15 }
  0x4f   : > { %s1502_s12 = scalar_lea.vmem %s1501_s15, 2048  ;;  %p1503_p7 = scmp.lt.s32.totalorder %s1955_s2, %s1501_s15 }
  0x50   : > { %p1498_p2 = pnand %p1496_p0, %p1911_p9  ;;  %p1504_p4 = scmp.lt.s32.totalorder %s1502_s12, %s1495_s4 }
  0x52   : > { %p1499_p6 = pneg %p1498_p2  ;;  %p1505_p1 = por %p1504_p4, %p1503_p7 }
  0x54   : > { %p1506_p3 = pnand %p1505_p1, %p1499_p6 }
  0x56   : > { %1509 = shalt.err (!%p1506_p3)
}
  0x57   : > { %s2456_s27 = smov 4   ;;  %s2457_s14 = smov 64  }
  0x58   : > { %s2458_s16 = smov 192   ;;  %s1987_s11 = sadd.s32 4294967295, %s1754_s6  }
  0x59   : > { %1266 = dma.hbm_to_vmem [thread:$0]  (!%p1897_p5), %s1951_s1, 1024, %s1955_s2, %s1959_s17, %s2458_s16, %s2457_s14, %s2456_s27  }
  0x5a   : > { %s1095_s5 = sadd.s32 4294967294, %s1754_s6   ;;  %s2459_s4 = sadd.s32 1, %s1746_s29 }
  0x5b   : > { %p37_p4 = scmp.ge.s32.totalorder %s2459_s4, 3  ;;  %s39_s28 = sadd.s32 1, %s1750_s30 }
  0x5c   : > { %s46_s15 = sadd.s32 1, %s1734_s26  ;;  %p53_p11 = scmp.ne.s32.totalorder %s1734_s26, %s1730_s25 }
  0x5d   : > { %s2460_s12 = smov %s2459_s4  ;;  %s2517_s28 = smov (!%p37_p4, %s39_s28), %s1750_s30 }
  0x5e   : > { %s2515_s12 = smov (%p37_p4, %s2460_s12), 0  ;;  %p2462_p8 = scmp.eq.s32.totalorder %s1754_s6, 0 }
  0x5f   : > { %2461 = sst [smem:[#allocation24_spill]] %s2515_s12  ;;  %p59_p12 = scmp.ne.s32.totalorder %s1730_s25, %s1726_s24 }
  0x60   : > { %p2003_p10 = por %p2462_p8, %p53_p11  ;;  %p41_p13 = scmp.ge.s32.totalorder %s2517_s28, 2 }
  0x61   : > { %p60_p0 = scmp.eq.s32.totalorder %s1987_s11, 0  ;;  %s69_s2 = ssub.s32 %s1746_s29, %s2515_s12 }
  0x62   : > { %s178_s16 = sadd.s32 1, %s1710_s20  ;;  %s2519_s28 = smov (%p41_p13, %s2517_s28), 0 }
  0x63   : > { %2464 = sst [smem:[#allocation25_spill]] %s2519_s28  ;;  %p2015_p2 = por %p60_p0, %p59_p12 }
  0x64   : > { %p70_p6 = scmp.eq.s32.totalorder %s69_s2, 0  ;;  %s43_s3 = ssub.s32 %s1750_s30, %s2519_s28 }
  0x65   : > { %s2465_s4 = scalar_select %p2015_p2, 1, 0 }
  0x66   : > { %p2467_p7 = scmp.ne.s32.totalorder %s1718_s22, %s1714_s21  ;;  %p44_p3 = scmp.eq.s32.totalorder %s43_s3, 0 }
  0x67   : > { %2466 = sst [smem:[#allocation26_spill]] %s2465_s4  ;;  %s175_s12 = sor.u32 %s69_s2, %s43_s3 }
  0x68   : > { %p2024_p1 = por %p2467_p7, %p60_p0  ;;  %s2470_s25 = sadd.s32 1, %s1722_s23 }
  0x69   : > { %s2031_s9 = scalar_select %p70_p6, %s1722_s23, %s2470_s25  }
  0x6a   : > { %s2468_s24 = scalar_select %p2024_p1, 1, 0 }
  0x6b   : > { %2471 = sst [smem:[#allocation28_spill]] %s2031_s9  ;;  %p176_p4 = scmp.eq.s32.totalorder %s175_s12, 0 }
  0x6c   : > { %2469 = sst [smem:[#allocation27_spill]] %s2468_s24  ;;  %p188_p11 = scmp.ne.s32.totalorder %s1710_s20, %s1706_s19 }
  0x6d   : > { %s2034_s17 = scalar_select %p44_p3, %s1734_s26, %s46_s15  }
  0x6e   : > { %p189_p8 = scmp.eq.s32.totalorder %s1987_s11, 5  ;;  %p194_p12 = scmp.ne.s32.totalorder %s1706_s19, %s1702_s18 }
  0x6f   : > { %2472 = sst [smem:[#allocation29_spill]] %s2034_s17  ;;  %p195_p0 = scmp.eq.s32.totalorder %s1095_s5, 5 }
  0x70   : > { %s2042_s4 = scalar_select %p176_p4, %s1710_s20, %s178_s16  }
  0x71   : > { %p2044_p13 = por %p189_p8, %p188_p11  ;;  %s215_s28 = sand.u32 1, %s1734_s26  }
  0x72   : > { %2473 = sst [smem:[#allocation30_spill]] %s2042_s4  ;;  %s1144_s24 = sshll.u32 %s1750_s30, 10 }
  0x73   : > { %s2474_s21 = scalar_select %p2044_p13, 1, 0 }
  0x74   : > { %p2050_p7 = por %p195_p0, %p194_p12  ;;  %s1098_s25 = sshll.u32 %s215_s28, 6 }
  0x75   : > { %s2476_s0 = sld [smem:[#allocation31_spill]]  ;;  %p2477_p6 = scmp.lt.s32.totalorder %s1754_s6, 6 }
  0x76   : > { %s2475_s3 = scalar_select %p2050_p7, 1, 0 }
  0x77   : > { %p2063_p3 = pnand %p2477_p6, %p2003_p10  ;;  %s219_s16 = scalar_lea.vmem [#allocation2], %s1098_s25 }
  0x78   : > { %s226_s30 = sshll.u32 %s219_s16, 4  ;;  %s2069_s17 = scalar_lea.sflag [#allocation3], %s215_s28  ;;  %s2067_s30 = int_to_ptr.vmem [resolvable:$true] %s226_s30 }
  0x79   : > { %p1512_p11 = pneg %p2063_p3 }
  0x7b   : > { %s2057_s12 = scalar_lea.hbm %s2476_s0, %s1144_s24  ;;  %s1515_s2 = scalar_lea.hbm %s2476_s0, 2048 }
  0x7c   : > { %s1510_s24 = scalar_lea.hbm %s2057_s12, 1024  ;;  %p1516_p10 = scmp.lt.u32.totalorder %s2057_s12, %s2476_s0 }
  0x7d   : > { %p1511_p4 = scmp.ne.s32.totalorder %s2057_s12, %s1510_s24  ;;  %p1517_p0 = scmp.lt.u32.totalorder %s1515_s2, %s1510_s24 }
  0x7e   : > { %p1519_p7 = scmp.lt.u32.totalorder %s1510_s24, %s2057_s12 }
  0x7f   : > { %p1513_p8 = pnand %p1512_p11, %p1511_p4  ;;  %p1518_p6 = por %p1517_p0, %p1516_p10 }
  0x81   : > { %p1514_p12 = pneg %p1513_p8  ;;  %p1520_p13 = por %p1519_p7, %p1518_p6 }
  0x83   : > { %p1521_p1 = pnand %p1520_p13, %p1514_p12 }
  0x85   : > { %1524 = shalt.err (!%p1521_p1)
}
  0x86   : > { %s1525_s28 = scalar_lea.vmem %s2067_s30, 1024  ;;  %s1761_s25 = smov [#allocation2]  }
  0x87   : > { %p1526_p4 = scmp.ne.s32.totalorder %s2067_s30, %s1525_s28  ;;  %s1530_s16 = sshll.u32 %s1761_s25, 4  ;;  %s1531_s16 = int_to_ptr.vmem [resolvable:$false] %s1530_s16 }
  0x88   : > { %s1532_s26 = scalar_lea.vmem %s1531_s16, 2048  ;;  %p1533_p5 = scmp.lt.s32.totalorder %s2067_s30, %s1531_s16 }
  0x89   : > { %p1528_p8 = pnand %p1526_p4, %p1512_p11  ;;  %p1534_p10 = scmp.lt.s32.totalorder %s1532_s26, %s1525_s28 }
  0x8b   : > { %p1529_p2 = pneg %p1528_p8  ;;  %p1535_p0 = por %p1534_p10, %p1533_p5 }
  0x8d   : > { %p1536_p7 = pnand %p1535_p0, %p1529_p2 }
  0x8f   : > { %1539 = shalt.err (!%p1536_p7)
}
  0x90   : > { %1257 = dma.hbm_to_vmem [thread:$0]  (!%p2063_p3), %s2057_s12, 1024, %s2067_s30, %s2069_s17, %s2457_s14, %s2457_s14, %s2456_s27  }
  0x91   : > { %s1103_s9 = sshll.u32 %s1746_s29, 4  ;;  %s259_s24 = scalar_lea.vmem [#allocation7], %s1880_s10 }
  0x92   : > { %s266_s1 = sshll.u32 %s259_s24, 4  ;;  %s2479_s28 = sld [smem:[#allocation33_spill]]  ;;  %s267_s1 = int_to_ptr.vmem [resolvable:$true] %s266_s1 }
  0x98   : > { %s2480_s16 = smov %s2479_s28  ;;  %s264_s25 = scalar_lea.hbm %s2479_s28, %s1103_s9 }
  0x99   : > { %s1540_s5 = scalar_lea.hbm %s264_s25, 16  ;;  %s1545_s23 = scalar_lea.hbm %s2480_s16, 48 }
  0x9a   : > { %p1541_p5 = scmp.ne.s32.totalorder %s264_s25, %s1540_s5  ;;  %p1546_p13 = scmp.lt.u32.totalorder %s264_s25, %s2480_s16 }
  0x9b   : > { %p1547_p3 = scmp.lt.u32.totalorder %s1545_s23, %s1540_s5  ;;  %p1549_p12 = scmp.lt.u32.totalorder %s1540_s5, %s264_s25 }
  0x9c   : > { %p1543_p2 = pnand %p1541_p5, %p1911_p9 }
  0x9d   : > { %p1548_p11 = por %p1547_p3, %p1546_p13 }
  0x9e   : > { %p1544_p1 = pneg %p1543_p2 }
  0x9f   : > { %p1550_p6 = por %p1549_p12, %p1548_p11 }
  0xa1   : > { %p1551_p4 = pnand %p1550_p6, %p1544_p1 }
  0xa3   : > { %1554 = shalt.err (!%p1551_p4)
}
  0xa4   : > { %s1555_s17 = scalar_lea.vmem %s267_s1, 16  ;;  %s1762_s27 = smov [#allocation7]  }
  0xa5   : > { %p1556_p8 = scmp.ne.s32.totalorder %s267_s1, %s1555_s17  ;;  %s1560_s14 = sshll.u32 %s1762_s27, 4  ;;  %s1561_s14 = int_to_ptr.vmem [resolvable:$false] %s1560_s14 }
  0xa6   : > { %s1562_s0 = scalar_lea.vmem %s1561_s14, 32  ;;  %p1563_p7 = scmp.lt.s32.totalorder %s267_s1, %s1561_s14 }
  0xa7   : > { %p1558_p10 = pnand %p1556_p8, %p1911_p9  ;;  %p1564_p5 = scmp.lt.s32.totalorder %s1562_s0, %s1555_s17 }
  0xa9   : > { %p1559_p0 = pneg %p1558_p10  ;;  %p1565_p2 = por %p1564_p5, %p1563_p7 }
  0xab   : > { %p1566_p3 = pnand %p1565_p2, %p1559_p0 }
  0xad   : > { %1569 = shalt.err (!%p1566_p3)
}
  0xae   : > { %p2481_p13 = scmp.ne.s32.totalorder %s2445_s8, 0  ;;  %s2482_s12 = sld [smem:[#allocation35_spill]] }
  0xaf   : > { %s296_s15 = scalar_lea.vmem [#allocation10], %s1880_s10 }
  0xb0   : > { %1263 = dma.hbm_to_vmem [thread:$0]  (!%p2481_p13), %s264_s25, 16, %s267_s1, %s1905_s13  }
  0xb1   : > { %s303_s2 = sshll.u32 %s296_s15, 4  ;;  %s304_s2 = int_to_ptr.vmem [resolvable:$true] %s303_s2 }
  0xb4   : > { %s2125_s24 = scalar_lea.hbm %s2482_s12, %s1103_s9  ;;  %s1575_s1 = scalar_lea.hbm %s2482_s12, 48 }
  0xb5   : > { %s1570_s28 = scalar_lea.hbm %s2125_s24, 16  ;;  %p1576_p6 = scmp.lt.u32.totalorder %s2125_s24, %s2482_s12 }
  0xb6   : > { %p1571_p1 = scmp.ne.s32.totalorder %s2125_s24, %s1570_s28  ;;  %p1577_p4 = scmp.lt.u32.totalorder %s1575_s1, %s1570_s28 }
  0xb7   : > { %p1579_p10 = scmp.lt.u32.totalorder %s1570_s28, %s2125_s24 }
  0xb8   : > { %p1573_p11 = pnand %p1571_p1, %p1911_p9  ;;  %p1578_p8 = por %p1577_p4, %p1576_p6 }
  0xba   : > { %p1574_p12 = pneg %p1573_p11  ;;  %p1580_p0 = por %p1579_p10, %p1578_p8 }
  0xbc   : > { %p1581_p7 = pnand %p1580_p0, %p1574_p12 }
  0xbe   : > { %1584 = shalt.err (!%p1581_p7)
}
  0xbf   : > { %s1585_s10 = scalar_lea.vmem %s304_s2, 16  ;;  %s1763_s9 = smov [#allocation10]  }
  0xc0   : > { %p1586_p5 = scmp.ne.s32.totalorder %s304_s2, %s1585_s10  ;;  %s1590_s30 = sshll.u32 %s1763_s9, 4  ;;  %s1591_s30 = int_to_ptr.vmem [resolvable:$false] %s1590_s30 }
  0xc1   : > { %s1592_s17 = scalar_lea.vmem %s1591_s30, 32  ;;  %p1593_p1 = scmp.lt.s32.totalorder %s304_s2, %s1591_s30 }
  0xc2   : > { %p1588_p2 = pnand %p1586_p5, %p1911_p9  ;;  %p1594_p11 = scmp.lt.s32.totalorder %s1592_s17, %s1585_s10 }
  0xc4   : > { %p1589_p3 = pneg %p1588_p2  ;;  %p1595_p13 = por %p1594_p11, %p1593_p1 }
  0xc6   : > { %p1596_p4 = pnand %p1595_p13, %p1589_p3 }
  0xc8   : > { %1599 = shalt.err (!%p1596_p4)
}
  0xc9   : > { %p2483_p6 = scmp.ne.s32.totalorder %s2445_s8, 0  ;;  %s2484_s27 = sld [smem:[#allocation23_spill]] }
  0xca   : > { %s2485_s14 = sld [smem:[#allocation22_spill]] }
  0xcf   : > { %1269 = dma.hbm_to_vmem [thread:$0]  (!%p2483_p6), %s2125_s24, 16, %s304_s2, %s2484_s27  }
  0xd0   : > { %p2486_p12 = scmp.ne.s32.totalorder %s2485_s14, 0 }
  0xd1   : > { %s2487_s7 = sld [smem:[#allocation17_spill]] (!%p2486_p12)  ;;  %s2488_s0 = sld [smem:[#allocation26_spill]] (!%p2486_p12) }
  0xd2   : > { %312 = sbr.rel (%p2486_p12) target bundleno = 540 (0x21c), region = 40 }
  0xd7   : > { %s314_s23 = sand.u32 (!%p2486_p12), 1, %s2487_s7   ;;  %p2489_p9 = scmp.ne.s32.totalorder (!%p2486_p12), %s2488_s0, 0 }
  0xd8   : > { %s1108_s4 = sshll.u32 (!%p2486_p12), %s314_s23, 6  ;;  %s315_s15 = scalar_lea.sflag (!%p2486_p12), [#allocation3], %s314_s23 }
  0xd9   : > { %s2149_s28 = scalar_lea.vmem [#allocation2], %s1108_s4 }
  0xda   : > { %1685 = dma.done.wait (%p2489_p9), %s315_s15, 1024  }
  0xdb   : > { %1687 = vsyncadd (%p2489_p9), %s315_s15, 4294966272  ;;  %s2490_s8 = sld [smem:[#allocation27_spill]]  ;;  %s323_s5 = sand.u32 1, %s1987_s11  }
  0xdc   : > { %s2157_s24 = sand.u32 1, %s1718_s22   ;;  %s324_s13 = scalar_lea.sflag [#allocation6], %s323_s5 }
  0xdd   : > { %s1109_s2 = sshll.u32 %s2157_s24, 6 }
  0xde   : > { %s2160_s1 = scalar_lea.vmem [#allocation5], %s1109_s2 }
  0xe1   : > { %p2491_p13 = scmp.ne.s32.totalorder %s2490_s8, 0 }
  0xe3   : > { %1689 = dma.done.wait (%p2491_p13), %s324_s13, 1040  }
  0xe4   : > { %1691 = vsyncadd (%p2491_p13), %s324_s13, 4294966256  ;;  %s335_s25 = scalar_lea.vmem [#allocation7], %s2157_s24  ;;  %s341_s26 = scalar_lea.sflag [#allocation9], %s323_s5 }
  0xe5   : > { %s2167_s10 = scalar_lea.vmem [#allocation8], %s1109_s2 }
  0xe6   : > { %1693 = dma.done.wait (%p2491_p13), %s341_s26, 1040  }
  0xe7   : > { %1695 = vsyncadd (%p2491_p13), %s341_s26, 4294966256  ;;  %v1394_v0 = vld [vmem:[%s2167_s10] sm:$0xff]   ;;  %v1395_v1 = vld [vmem:[%s2167_s10 + $0x8] sm:$0xff]   ;;  %s352_s11 = scalar_lea.vmem [#allocation10], %s2157_s24  ;;  %s394_s9 = sand.u32 1, %s1706_s19  }
  0xe8   : > { %1209 = vmatprep.subr.bf16.mxu1 %v1394_v0  ;;  %v1396_v2 = vld [vmem:[%s2167_s10 + $0x10] sm:$0xff]   ;;  %v1398_v3 = vld [vmem:[%s2160_s1] sm:$0xff]   ;;  %v1400_v4 = vld [vmem:[%s2160_s1 + $0x8] sm:$0xff]   ;;  %s2226_s30 = sshll.u32 %s394_s9, 7  ;;  %s2492_s27 = sld [smem:[#allocation20_spill]] }
  0xe9   : > { %1210 = vmatpush3.bf16.msra.mxu1 %v1394_v0  ;;  %1177 = vmatprep.subr.bf16.mxu0 %v1398_v3  ;;  %v1397_v5 = vld [vmem:[%s2167_s10 + $0x18] sm:$0xff]   ;;  %v1402_v6 = vld [vmem:[%s2160_s1 + $0x10] sm:$0xff]   ;;  %v1399_v7 = vld [vmem:[%s2167_s10 + $0x20] sm:$0xff]   ;;  %s2248_s17 = scalar_lea.vmem [#allocation11], %s2226_s30  ;;  %s2493_s7 = sld [smem:[#allocation19_spill]] }
  0xea   : > { %1211 = vmatprep.subr.bf16.mxu1 %v1395_v1  ;;  %1178 = vmatpush3.bf16.msra.mxu0 %v1398_v3  ;;  %v1404_v8 = vld [vmem:[%s2160_s1 + $0x18] sm:$0xff]   ;;  %v1407_v9 = vld [vmem:[%s2149_s28] sm:$0xff]   ;;  %v1401_v10 = vld [vmem:[%s2167_s10 + $0x28] sm:$0xff]   ;;  %s928_s4 = sshll.u32 %s2248_s17, 4  ;;  %s2494_s8 = sld [smem:[#allocation36_spill]]  ;;  %s2314_s4 = int_to_ptr.vmem [resolvable:$true] %s928_s4 }
  0xeb   : > { %1179 = vmatprep.subr.bf16.mxu0 %v1400_v4  ;;  %v1406_v11 = vld [vmem:[%s2160_s1 + $0x20] sm:$0xff]   ;;  %1225 = vmatprep.mubr.bf16.mxu1 %v1407_v9  ;;  %v1403_v12 = vld [vmem:[%s2167_s10 + $0x30] sm:$0xff]   ;;  %v1409_v13 = vld [vmem:[%s2160_s1 + $0x28] sm:$0xff]   ;;  %s2320_s24 = scalar_lea.sflag [#allocation4], %s394_s9  ;;  %s1600_s2 = scalar_lea.vmem %s2314_s4, 2048 }
  0xec   : > { %1193 = vmatprep.mubr.bf16.mxu0 %v1407_v9  ;;  %v1405_v14 = vld [vmem:[%s2167_s10 + $0x38] sm:$0xff]   ;;  %v1410_v15 = vld [vmem:[%s2160_s1 + $0x30] sm:$0xff]   ;;  %v1408_v17 = vld [vmem:[%s2149_s28 + $0x8] sm:$0xff]   ;;  %p1601_p8 = scmp.ne.s32.totalorder %s2314_s4, %s1600_s2  ;;  %p2495_p10 = scmp.ne.s32.totalorder %s2474_s21, 0 }
  0xed   : > { %1212 = vmatpush3.bf16.msra.mxu1 %v1395_v1  ;;  %v1413_v16 = vld [vmem:[%s2160_s1 + $0x38] sm:$0xff]   ;;  %v1411_v18 = vld [vmem:[%s2149_s28 + $0x10] sm:$0xff]   ;;  %v1414_v20 = vld [vmem:[%s2149_s28 + $0x20] sm:$0xff]   ;;  %s1764_s13 = smov [#allocation11]  }
  0xee   : > { %1213 = vmatprep.subr.bf16.mxu1 %v1396_v2  ;;  %1180 = vmatpush3.bf16.msra.mxu0 %v1400_v4  ;;  %v1412_v19 = vld [vmem:[%s2149_s28 + $0x18] sm:$0xff]   ;;  %v1415_v21 = vld [vmem:[%s2149_s28 + $0x28] sm:$0xff]   ;;  %v1416_v22 = vld [vmem:[%s2149_s28 + $0x30] sm:$0xff]   ;;  %s1241_s14 = smul.u32 48, %s2492_s27  ;;  %p1602_p0 = pnand %p1601_p8, %p2495_p10 }
  0xef   : > { %1181 = vmatprep.subr.bf16.mxu0 %v1402_v6  ;;  %v1417_v23 = vld [vmem:[%s2149_s28 + $0x38] sm:$0xff]   ;;  %v2198_v24 = vld [vmem:[%s352_s11] ss:$0 sm:$0xff]  ;;  %s1604_s1 = sshll.u32 %s1764_s13, 4  ;;  %s1605_s1 = int_to_ptr.vmem [resolvable:$false] %s1604_s1 }
  0xf0   : > { %v2215_v53 = vld [vmem:[%s335_s25] ss:$0 sm:$0xff]  ;;  %s925_s0 = sadd.s32 %s2493_s7, %s1241_s14  ;;  %p1603_p7 = pneg %p1602_p0 }
  0xf1   : > { %1214 = vmatpush3.bf16.msra.mxu1 %v1396_v2  ;;  %s1141_s23 = sshll.u32 %s925_s0, 7  ;;  %s1606_s25 = scalar_lea.vmem %s1605_s1, 4096 }
  0xf2   : > { %1215 = vmatprep.subr.bf16.mxu1 %v1397_v5  ;;  %1182 = vmatpush3.bf16.msra.mxu0 %v1402_v6  ;;  %s2312_s5 = scalar_lea.hbm %s2494_s8, %s1141_s23  ;;  %p1607_p5 = scmp.lt.s32.totalorder %s2314_s4, %s1605_s1 }
  0xf3   : > { %1183 = vmatprep.subr.bf16.mxu0 %v1404_v8  ;;  %p1608_p2 = scmp.lt.s32.totalorder %s1606_s25, %s1600_s2 }
  0xf5   : > { %1216 = vmatpush3.bf16.msra.mxu1 %v1397_v5  ;;  %p1609_p3 = por %p1608_p2, %p1607_p5 }
  0xf6   : > { %1217 = vmatprep.subr.bf16.mxu1 %v1399_v7  ;;  %1184 = vmatpush3.bf16.msra.mxu0 %v1404_v8 }
  0xf7   : > { %1185 = vmatprep.subr.bf16.mxu0 %v1406_v11  ;;  %p1610_p1 = pnand %p1609_p3, %p1603_p7 }
  0xf9   : > { %1218 = vmatpush3.bf16.msra.mxu1 %v1399_v7 }
  0xfa   : > { %1219 = vmatprep.subr.bf16.mxu1 %v1401_v10  ;;  %1186 = vmatpush3.bf16.msra.mxu0 %v1406_v11 }
  0xfb   : > { %1187 = vmatprep.subr.bf16.mxu0 %v1409_v13 }
  0xfd   : > { %1220 = vmatpush3.bf16.msra.mxu1 %v1401_v10 }
  0xfe   : > { %1221 = vmatprep.subr.bf16.mxu1 %v1403_v12  ;;  %1188 = vmatpush3.bf16.msra.mxu0 %v1409_v13 }
  0xff   : > { %1189 = vmatprep.subr.bf16.mxu0 %v1410_v15 }
 0x101   : > { %1222 = vmatpush3.bf16.msra.mxu1 %v1403_v12 }
 0x102   : > { %1223 = vmatprep.subr.bf16.mxu1 %v1405_v14  ;;  %1190 = vmatpush3.bf16.msra.mxu0 %v1410_v15 }
 0x103   : > { %1191 = vmatprep.subr.bf16.mxu0 %v1413_v16 }
 0x105   : > { %1224 = vmatpush3.bf16.msra.mxu1 %v1405_v14 }
 0x106   : > { %1192 = vmatpush3.bf16.msra.mxu0 %v1413_v16 }
 0x108   : > { %1226 = vmatmul.mubr.bf16.vlgmr.msra.gmra.mrb[0].mxu1 %v1408_v17 }
 0x109   : > { %1229 = vmatprep.mubr.bf16.mxu1 %v1411_v18  ;;  %1194 = vmatmul.mubr.bf16.vlgmr.msra.gmra.mrb[0].mxu0 %v1408_v17 }
 0x10a   : > { %1197 = vmatprep.mubr.bf16.mxu0 %v1411_v18 }
 0x110   : > { %1230 = vmatmul.mubr.bf16.gmra.mrb[4].mxu1 %v1412_v19 }
 0x111   : > { %1233 = vmatprep.mubr.bf16.mxu1 %v1414_v20  ;;  %1198 = vmatmul.mubr.bf16.gmra.mrb[4].mxu0 %v1412_v19 }
 0x112   : > { %1201 = vmatprep.mubr.bf16.mxu0 %v1414_v20 }
 0x118   : > { %1234 = vmatmul.mubr.bf16.gmra.mrb[8].mxu1 %v1415_v21 }
 0x119   : > { %1237 = vmatprep.mubr.bf16.mxu1 %v1416_v22  ;;  %1202 = vmatmul.mubr.bf16.gmra.mrb[8].mxu0 %v1415_v21 }
 0x11a   : > { %1205 = vmatprep.mubr.bf16.mxu0 %v1416_v22 }
 0x120   : > { %1238 = vmatmul.mubr.bf16.gmra.mrb[12].mxu1 %v1417_v23 }
 0x121   : > { %1206 = vmatmul.mubr.bf16.gmra.mrb[12].mxu0 %v1417_v23 }
 0x1db   : > { %v1227_v25 = vpop.f32.mrb[0].mxu1 }
 0x1dc   : > { %v746_v26 = vadd.f32 %v1227_v25, %v2198_v24  ;;  %v737_v27 = vpop.f32.mrb[1].mxu1  ;;  %v1195_v35 = vpop.f32.mrb[0].mxu0 }
 0x1dd   : > { %v738_v28 = vadd.f32 %v2198_v24, %v737_v27  ;;  %v1228_v29 = vpop.f32.mrb[2].mxu1  ;;  %v569_v37 = vpop.f32.mrb[1].mxu0  ;;  %v578_v63 = vadd.f32 %v1195_v35, %v2215_v53 }
 0x1de   : > { %v818_v30 = vmul.f32 0.70710677, %v746_v26  ;;  %v749_v31 = vadd.f32 %v1228_v29, %v2198_v24  ;;  %v740_v32 = vpop.f32.mrb[3].mxu1  ;;  %v1196_v39 = vpop.f32.mrb[2].mxu0  ;;  %v802_v58 = vmul.f32 0.5, %v746_v26  ;;  %v570_v4 = vadd.f32 %v2215_v53, %v569_v37 }
 0x1df   : > { %v816_v33 = vmul.f32 0.70710677, %v738_v28  ;;  %v741_v34 = vadd.f32 %v2198_v24, %v740_v32  ;;  %v572_v40 = vpop.f32.mrb[3].mxu0  ;;  %v800_v62 = vmul.f32 0.5, %v738_v28  ;;  %v581_v15 = vadd.f32 %v1196_v39, %v2215_v53 }
 0x1e0   : > { %1418 = verf.f32 %v818_v30  ;;  %v819_v36 = vmul.f32 0.70710677, %v749_v31  ;;  %v803_v3 = vmul.f32 0.5, %v749_v31  ;;  %v573_v20 = vadd.f32 %v2215_v53, %v572_v40 }
 0x1e1   : > { %1420 = verf.f32 %v816_v33  ;;  %v817_v38 = vmul.f32 0.70710677, %v741_v34  ;;  %v801_v9 = vmul.f32 0.5, %v741_v34 }
 0x1e2   : > { %1422 = verf.f32 %v819_v36 }
 0x1e3   : > { %1424 = verf.f32 %v817_v38  ;;  %v1231_v41 = vpop.f32.mrb[4].mxu1 }
 0x1e4   : > { %v762_v42 = vadd.f32 %v1231_v41, %v2198_v24  ;;  %v753_v43 = vpop.f32.mrb[5].mxu1  ;;  %v2210_v51 = vpop.f32.mrb[4].mxu0 }
 0x1e5   : > { %v754_v44 = vadd.f32 %v2198_v24, %v753_v43  ;;  %v1232_v45 = vpop.f32.mrb[6].mxu1  ;;  %v2217_v54 = vpop.f32.mrb[5].mxu0 }
 0x1e6   : > { %v822_v46 = vmul.f32 0.70710677, %v762_v42  ;;  %v765_v47 = vadd.f32 %v1232_v45, %v2198_v24  ;;  %v756_v48 = vpop.f32.mrb[7].mxu1  ;;  %v2220_v56 = vpop.f32.mrb[6].mxu0  ;;  %v806_v28 = vmul.f32 0.5, %v762_v42  ;;  %v594_v42 = vadd.f32 %v2210_v51, %v2215_v53 }
 0x1e7   : > { %v820_v49 = vmul.f32 0.70710677, %v754_v44  ;;  %v2208_v50 = vadd.f32 %v2198_v24, %v756_v48  ;;  %v2222_v59 = vpop.f32.mrb[7].mxu0  ;;  %v804_v33 = vmul.f32 0.5, %v754_v44 }
 0x1e8   : > { %1426 = verf.f32 %v822_v46  ;;  %v823_v52 = vmul.f32 0.70710677, %v765_v47  ;;  %v807_v34 = vmul.f32 0.5, %v765_v47  ;;  %v586_v46 = vadd.f32 %v2215_v53, %v2217_v54 }
 0x1e9   : > { %1428 = verf.f32 %v820_v49  ;;  %v821_v55 = vmul.f32 0.70710677, %v2208_v50  ;;  %v805_v40 = vmul.f32 0.5, %v2208_v50 }
 0x1ea   : > { %v1419_v57 = vpop.eup %1418  ;;  %1430 = verf.f32 %v823_v52 }
 0x1eb   : > { %v1421_v60 = vpop.eup %1420  ;;  %v850_v61 = vadd.f32 1.0, %v1419_v57  ;;  %1432 = verf.f32 %v821_v55  ;;  %v1235_v0 = vpop.f32.mrb[8].mxu1 }
 0x1ec   : > { %v1423_v1 = vpop.eup %1422  ;;  %v848_v2 = vadd.f32 1.0, %v1421_v60  ;;  %v2231_v5 = vadd.f32 %v1235_v0, %v2198_v24  ;;  %v769_v6 = vpop.f32.mrb[9].mxu1  ;;  %v597_v60 = vadd.f32 %v2220_v56, %v2215_v53  ;;  %v589_v0 = vadd.f32 %v2215_v53, %v2222_v59 }
 0x1ed   : > { %v1425_v7 = vpop.eup %1424  ;;  %v851_v8 = vadd.f32 1.0, %v1423_v1  ;;  %v866_v10 = vmul.f32 %v850_v61, %v802_v58  ;;  %v2234_v11 = vadd.f32 %v2198_v24, %v769_v6  ;;  %v1236_v12 = vpop.f32.mrb[10].mxu1 }
 0x1ee   : > { %v849_v13 = vadd.f32 1.0, %v1425_v7  ;;  %v864_v14 = vmul.f32 %v848_v2, %v800_v62  ;;  %v826_v16 = vmul.f32 0.70710677, %v2231_v5  ;;  %v772_v17 = vpop.f32.mrb[11].mxu1  ;;  %v2240_v22 = vpop.f32.mrb[8].mxu0  ;;  %v2243_v26 = vadd.f32 %v1236_v12, %v2198_v24 }
 0x1ef   : > { %v882_v18 = vmul.f32 %v866_v10, %v578_v63  ;;  %v867_v19 = vmul.f32 %v851_v8, %v803_v3  ;;  %v824_v21 = vmul.f32 0.70710677, %v2234_v11  ;;  %v2245_v27 = vpop.f32.mrb[9].mxu0  ;;  %v2252_v30 = vadd.f32 %v2198_v24, %v772_v17 }
 0x1f0   : > { %v880_v23 = vmul.f32 %v864_v14, %v570_v4  ;;  %1434 = verf.f32 %v826_v16  ;;  %v865_v25 = vmul.f32 %v849_v13, %v801_v9  ;;  %v2254_v31 = vpop.f32.mrb[10].mxu0  ;;  %v827_v36 = vmul.f32 0.70710677, %v2243_v26 }
 0x1f1   : > { %898 = vst [vmem:[%s2248_s17 + $0x10] sm:$0xff] %v882_v18  ;;  %v883_v29 = vmul.f32 %v867_v19, %v581_v15  ;;  %1436 = verf.f32 %v824_v21  ;;  %v2258_v37 = vpop.f32.mrb[11].mxu0  ;;  %v825_v41 = vmul.f32 0.70710677, %v2252_v30  ;;  %v810_v15 = vmul.f32 0.5, %v2231_v5 }
 0x1f2   : > { %v1427_v32 = vpop.eup %1426  ;;  %896 = vst [vmem:[%s2248_s17] sm:$0xff] %v880_v23  ;;  %v881_v35 = vmul.f32 %v865_v25, %v573_v20  ;;  %1438 = verf.f32 %v827_v36  ;;  %v610_v18 = vadd.f32 %v2240_v22, %v2215_v53  ;;  %v808_v19 = vmul.f32 0.5, %v2234_v11 }
 0x1f3   : > { %v1429_v38 = vpop.eup %1428  ;;  %v854_v39 = vadd.f32 1.0, %v1427_v32  ;;  %899 = vst [vmem:[%s2248_s17 + $0x18] sm:$0xff] %v883_v29  ;;  %v1239_v43 = vpop.f32.mrb[12].mxu1  ;;  %1440 = verf.f32 %v825_v41  ;;  %v809_v11 = vmul.f32 0.5, %v2252_v30 }
 0x1f4   : > { %v1431_v45 = vpop.eup %1430  ;;  %v852_v44 = vadd.f32 1.0, %v1429_v38  ;;  %897 = vst [vmem:[%s2248_s17 + $0x8] sm:$0xff] %v881_v35  ;;  %v2269_v47 = vadd.f32 %v1239_v43, %v2198_v24  ;;  %v785_v48 = vpop.f32.mrb[13].mxu1 }
 0x1f5   : > { %v1433_v49 = vpop.eup %1432  ;;  %v855_v50 = vadd.f32 1.0, %v1431_v45  ;;  %v870_v52 = vmul.f32 %v854_v39, %v806_v28  ;;  %v786_v55 = vadd.f32 %v2198_v24, %v785_v48  ;;  %v1240_v57 = vpop.f32.mrb[14].mxu1  ;;  %v811_v28 = vmul.f32 0.5, %v2243_v26 }
 0x1f6   : > { %v853_v51 = vadd.f32 1.0, %v1433_v49  ;;  %v868_v58 = vmul.f32 %v852_v44, %v804_v33  ;;  %v830_v61 = vmul.f32 0.70710677, %v2269_v47  ;;  %v788_v54 = vpop.f32.mrb[15].mxu1  ;;  %v1207_v2 = vpop.f32.mrb[12].mxu0  ;;  %v797_v6 = vadd.f32 %v1240_v57, %v2198_v24 }
 0x1f7   : > { %v886_v62 = vmul.f32 %v870_v52, %v594_v42  ;;  %v871_v63 = vmul.f32 %v855_v50, %v807_v34  ;;  %v828_v1 = vmul.f32 0.70710677, %v786_v55  ;;  %v617_v7 = vpop.f32.mrb[13].mxu0  ;;  %v789_v8 = vadd.f32 %v2198_v24, %v788_v54 }
 0x1f8   : > { %v884_v3 = vmul.f32 %v868_v58, %v586_v46  ;;  %1442 = verf.f32 %v830_v61  ;;  %v869_v4 = vmul.f32 %v853_v51, %v805_v40  ;;  %v1208_v9 = vpop.f32.mrb[14].mxu0  ;;  %v831_v59 = vmul.f32 0.70710677, %v797_v6 }
 0x1f9   : > { %902 = vst [vmem:[%s2248_s17 + $0x30] sm:$0xff] %v886_v62  ;;  %v887_v56 = vmul.f32 %v871_v63, %v597_v60  ;;  %1444 = verf.f32 %v828_v1  ;;  %v620_v13 = vpop.f32.mrb[15].mxu0  ;;  %v829_v17 = vmul.f32 0.70710677, %v789_v8  ;;  %v602_v24 = vadd.f32 %v2215_v53, %v2245_v27 }
 0x1fa   : > { %v1435_v10 = vpop.eup %1434  ;;  %900 = vst [vmem:[%s2248_s17 + $0x20] sm:$0xff] %v884_v3  ;;  %v885_v12 = vmul.f32 %v869_v4, %v589_v0  ;;  %1446 = verf.f32 %v831_v59  ;;  %v613_v27 = vadd.f32 %v2254_v31, %v2215_v53  ;;  %v605_v26 = vadd.f32 %v2215_v53, %v2258_v37 }
 0x1fb   : > { %v1437_v14 = vpop.eup %1436  ;;  %v858_v16 = vadd.f32 1.0, %v1435_v10  ;;  %903 = vst [vmem:[%s2248_s17 + $0x38] sm:$0xff] %v887_v56  ;;  %1448 = verf.f32 %v829_v17  ;;  %v814_v30 = vmul.f32 0.5, %v2269_v47  ;;  %v626_v41 = vadd.f32 %v1207_v2, %v2215_v53 }
 0x1fc   : > { %v856_v20 = vadd.f32 1.0, %v1437_v14  ;;  %901 = vst [vmem:[%s2248_s17 + $0x28] sm:$0xff] %v885_v12  ;;  %v1439_v5 = vpop.eup %1438  ;;  %v812_v42 = vmul.f32 0.5, %v786_v55  ;;  %v618_v31 = vadd.f32 %v2215_v53, %v617_v7  ;;  %v815_v47 = vmul.f32 0.5, %v797_v6 }
 0x1fd   : > { %v874_v21 = vmul.f32 %v858_v16, %v810_v15  ;;  %v1441_v25 = vpop.eup %1440  ;;  %v859_v29 = vadd.f32 1.0, %v1439_v5  ;;  %v813_v52 = vmul.f32 0.5, %v789_v8  ;;  %v629_v51 = vadd.f32 %v1208_v9, %v2215_v53 }
 0x1fe   : > { %v872_v23 = vmul.f32 %v856_v20, %v808_v19  ;;  %v857_v32 = vadd.f32 1.0, %v1441_v25  ;;  %v621_v60 = vadd.f32 %v2215_v53, %v620_v13 }
 0x1ff   : > { %v890_v22 = vmul.f32 %v874_v21, %v610_v18  ;;  %v875_v34 = vmul.f32 %v859_v29, %v811_v28 }
 0x200   : > { %v888_v33 = vmul.f32 %v872_v23, %v602_v24  ;;  %v873_v36 = vmul.f32 %v857_v32, %v809_v11 }
 0x201   : > { %906 = vst [vmem:[%s2248_s17 + $0x50] sm:$0xff] %v890_v22  ;;  %v891_v40 = vmul.f32 %v875_v34, %v613_v27 }
 0x202   : > { %v1443_v35 = vpop.eup %1442  ;;  %904 = vst [vmem:[%s2248_s17 + $0x40] sm:$0xff] %v888_v33  ;;  %v889_v45 = vmul.f32 %v873_v36, %v605_v26 }
 0x203   : > { %v1445_v38 = vpop.eup %1444  ;;  %v862_v39 = vadd.f32 1.0, %v1443_v35  ;;  %907 = vst [vmem:[%s2248_s17 + $0x58] sm:$0xff] %v891_v40 }
 0x204   : > { %v860_v43 = vadd.f32 1.0, %v1445_v38  ;;  %v1447_v37 = vpop.eup %1446  ;;  %905 = vst [vmem:[%s2248_s17 + $0x48] sm:$0xff] %v889_v45 }
 0x205   : > { %v878_v44 = vmul.f32 %v862_v39, %v814_v30  ;;  %v1449_v48 = vpop.eup %1448  ;;  %v863_v49 = vadd.f32 1.0, %v1447_v37 }
 0x206   : > { %v876_v46 = vmul.f32 %v860_v43, %v812_v42  ;;  %v861_v55 = vadd.f32 1.0, %v1449_v48 }
 0x207   : > { %v894_v50 = vmul.f32 %v878_v44, %v626_v41  ;;  %v879_v58 = vmul.f32 %v863_v49, %v815_v47 }
 0x208   : > { %v892_v57 = vmul.f32 %v876_v46, %v618_v31  ;;  %v877_v61 = vmul.f32 %v861_v55, %v813_v52 }
 0x209   : > { %910 = vst [vmem:[%s2248_s17 + $0x70] sm:$0xff] %v894_v50  ;;  %v895_v54 = vmul.f32 %v879_v58, %v629_v51 }
 0x20a   : > { %908 = vst [vmem:[%s2248_s17 + $0x60] sm:$0xff] %v892_v57  ;;  %v893_v62 = vmul.f32 %v877_v61, %v621_v60 }
 0x20b   : > { %911 = vst [vmem:[%s2248_s17 + $0x78] sm:$0xff] %v895_v54 }
 0x20c   : > { %909 = vst [vmem:[%s2248_s17 + $0x68] sm:$0xff] %v893_v62 }
 0x20d   : > { %1613 = shalt.err (!%p1610_p1)
}
 0x20e   : > { %s1614_s26 = scalar_lea.hbm %s2312_s5, 2048  ;;  %s1618_s9 = scalar_lea.hbm %s2494_s8, 12288 }
 0x20f   : > { %p1615_p11 = scmp.ne.s32.totalorder %s2312_s5, %s1614_s26  ;;  %p1619_p12 = scmp.lt.u32.totalorder %s2312_s5, %s2494_s8 }
 0x210   : > { %p1620_p9 = scmp.lt.u32.totalorder %s1618_s9, %s1614_s26  ;;  %p1622_p8 = scmp.lt.u32.totalorder %s1614_s26, %s2312_s5 }
 0x211   : > { %p1616_p4 = pnand %p1615_p11, %p2495_p10 }
 0x212   : > { %p1621_p13 = por %p1620_p9, %p1619_p12 }
 0x213   : > { %p1617_p6 = pneg %p1616_p4 }
 0x214   : > { %p1623_p0 = por %p1622_p8, %p1621_p13 }
 0x216   : > { %p1624_p7 = pnand %p1623_p0, %p1617_p6 }
 0x218   : > { %1627 = shalt.err (!%p1624_p7)
}
 0x219   : > { %s1765_s27 = smov 128   ;;  %s1766_s14 = smov 384  }
 0x21a   : > { %s1767_s7 = smov 8  }
 0x21b   : > { %1252 = dma.vmem_to_hbm [thread:$0]  (%p2495_p10), %s2314_s4, 2048, %s2312_s5, %s2320_s24, %s1765_s27, %s1766_s14, %s1767_s7  }
 0x21c PF: > { %p1275_p5 = scmp.ge.s32.totalorder %s1754_s6, 2  ;;  %s943_s0 = sand.u32 1, %s1702_s18  }
 0x21d   : > { %p2496_p2 = scmp.ne.s32.totalorder %s2475_s3, 0  ;;  %s944_s23 = scalar_lea.sflag [#allocation4], %s943_s0 }
 0x21f   : > { %p1271_p3 = pnand %p1275_p5, %p2496_p2 }
 0x221   : > { %1697 = dma.done.wait (!%p1271_p3), %s944_s23, 2048  }
 0x222   : > { %1699 = vsyncadd (!%p1271_p3), %s944_s23, 4294965248  ;;  %s27_s6 = sadd.s32 1, %s1754_s6   ;;  %s2498_s21 = sld [smem:[#allocation30_spill]] }
 0x223   : > { %p2349_p1 = scmp.ge.s32.totalorder %s27_s6, 8   ;;  %s2499_s4 = sld [smem:[#allocation16_spill]] }
 0x224   : > { %s2500_s23 = sld [smem:[#allocation28_spill]]  ;;  %s2501_s24 = sld [smem:[#allocation17_spill]] }
 0x225   : > { %s2502_s25 = sld [smem:[#allocation18_spill]]  ;;  %s2503_s26 = sld [smem:[#allocation29_spill]] }
 0x226   : > { %s2504_s28 = sld [smem:[#allocation21_spill]]  ;;  %s2505_s3 = sld [smem:[#allocation24_spill]] }
 0x227   : > { %s2506_s30 = sld [smem:[#allocation25_spill]]  ;;  %s2507_s18 = smov %s1706_s19 }
 0x228   : > { %s2508_s19 = smov %s1710_s20  ;;  %s2509_s20 = smov %s2498_s21 }
 0x229   : > { %s2510_s21 = smov %s1718_s22  ;;  %s2511_s22 = smov %s2499_s4 }
 0x22a   : > { %s2512_s27 = smov %s1746_s29  ;;  %26 = sbr.rel (!%p2349_p1) target bundleno = 21 (0x15), region = 133 }
 0x22c   : > { %s2513_s29 = smov %s2505_s3 }
 0x231   :  { %949 = vsyncpa [#allocation3], 1 }
 0x232   :  { %951 = vsyncpa [#allocation3 + $0x1], 1 }
 0x233   :  { %952 = vsyncpa [#allocation6], 1 }
 0x234   :  { %954 = vsyncpa [#allocation6 + $0x1], 1 }
 0x235   :  { %955 = vsyncpa [#allocation9], 1 }
 0x236   :  { %957 = vsyncpa [#allocation9 + $0x1], 1 }
 0x237   :  { %958 = vsyncpa [#allocation4], 1 }
 0x238   :  { %960 = vsyncpa [#allocation4 + $0x1], 1 }

</bundles_post_ra>
